<compile_context>
chip_gen: v5e
topology: v5e:2x2
jax: 0.10.0
libtpu: 0.0.40
codegen_flags: <defaults>
</compile_context>

<pallas_src>
import numpy as np
import jax
import jax.numpy as jnp
from jax.experimental import pallas as pl
from jax.experimental.pallas import tpu as pltpu

# ---------------------------------------------------------------------------
# Constant tables (standard JPEG Annex-K quantization tables, 8x8 DCT basis)
# ---------------------------------------------------------------------------

_Q_LUMA = np.array(
    [[16, 11, 10, 16, 24, 40, 51, 61],
     [12, 12, 14, 19, 26, 58, 60, 55],
     [14, 13, 16, 24, 40, 57, 69, 56],
     [14, 17, 22, 29, 51, 87, 80, 62],
     [18, 22, 37, 56, 68, 109, 103, 77],
     [24, 35, 55, 64, 81, 104, 113, 92],
     [49, 64, 78, 87, 103, 121, 120, 101],
     [72, 92, 95, 98, 112, 100, 103, 99]], dtype=np.float32)

_Q_CHROMA = np.array(
    [[17, 18, 24, 47, 99, 99, 99, 99],
     [18, 21, 26, 66, 99, 99, 99, 99],
     [24, 26, 56, 99, 99, 99, 99, 99],
     [47, 66, 99, 99, 99, 99, 99, 99],
     [99, 99, 99, 99, 99, 99, 99, 99],
     [99, 99, 99, 99, 99, 99, 99, 99],
     [99, 99, 99, 99, 99, 99, 99, 99],
     [99, 99, 99, 99, 99, 99, 99, 99]], dtype=np.float32)


def _dct8_matrix() -> np.ndarray:
    """Orthonormal 8-point DCT-II matrix D such that coef = D @ x @ D.T."""
    k = np.arange(8)[:, None].astype(np.float64)
    n = np.arange(8)[None, :].astype(np.float64)
    alpha = np.where(k == 0, np.sqrt(1.0 / 8.0), np.sqrt(2.0 / 8.0))
    D = alpha * np.cos((2.0 * n + 1.0) * k * np.pi / 16.0)
    return D.astype(np.float32)


def _block_diag_dct(size: int) -> np.ndarray:
    """Block-diagonal matrix applying the 8-pt DCT to every 8-row group."""
    assert size % 8 == 0
    return np.kron(np.eye(size // 8, dtype=np.float32), _dct8_matrix())


def _pick_tile(dim: int, cap: int, step: int) -> int:
    """Largest tile <= cap that divides `dim` and is a multiple of `step`.

    Falls back to the full dimension (always legal for BlockSpec)."""
    if dim <= cap:
        return dim
    t = (cap // step) * step
    while t >= step:
        if dim % t == 0:
            return t
        t -= step
    return dim


# ---------------------------------------------------------------------------
# Pallas kernel: full JPEG lossy pipeline for one (3, tH, tW) spatial tile
# ---------------------------------------------------------------------------

def _jpeg_kernel(rgb_ref, qmap_ref, rqmap_ref,
                 ah_ref, aht_ref, aw_ref, awt_ref, out_ref):
    # rgb_ref  : (1, 3, tH, tW) f32   RGB tile, values in [0, 255]
    # qmap_ref : (1, 3*tH, tW) f32    row-stacked [q_luma; q_chroma; q_chroma]
    # rqmap_ref: (1, 3*tH, tW) f32    elementwise reciprocal of qmap
    # ah_ref   : (tH, tH) f32         block-diagonal DCT (rows)
    # aht_ref  : (tH, tH) f32         its transpose (precomputed)
    # aw_ref   : (tW, tW) f32         block-diagonal DCT (cols)
    # awt_ref  : (tW, tW) f32         its transpose (precomputed)
    # out_ref  : (1, 3, tH, tW) uint8 reconstructed RGB
    th = rgb_ref.shape[2]

    r = rgb_ref[0, 0]
    g = rgb_ref[0, 1]
    b = rgb_ref[0, 2]

    # RGB -> YCbCr (JFIF full range), already level-shifted by -128
    # (the +128 offset of Cb/Cr cancels exactly with the level shift).
    y = 0.299 * r + 0.587 * g + 0.114 * b - 128.0
    cb = -0.168735892 * r - 0.331264108 * g + 0.5 * b
    cr = 0.5 * r - 0.418687589 * g - 0.081312411 * b

    # Row-stack the three planes (sublane-aligned: tH is a multiple of 8).
    x = jnp.concatenate([y, cb, cr], axis=0)                    # (3*tH, tW)

    ah = ah_ref[...]
    aht = aht_ref[...]
    aw = aw_ref[...]
    awt = awt_ref[...]

    # Forward DCT, column pass (fused across planes): X @ A_W^T
    t = jnp.dot(x, awt, preferred_element_type=jnp.float32)     # (3*tH, tW)

    # Forward DCT, row pass (per plane): A_H @ T_p
    coef = jnp.concatenate(
        [jnp.dot(ah, t[p * th:(p + 1) * th, :],
                 preferred_element_type=jnp.float32)
         for p in range(3)], axis=0)                            # (3*tH, tW)

    # Quantize / dequantize (multiply by precomputed reciprocal, no divides).
    coef_q = jnp.round(coef * rqmap_ref[0]) * qmap_ref[0]

    # Inverse DCT, row pass (per plane): A_H^T @ Cq_p
    t2 = jnp.concatenate(
        [jnp.dot(aht, coef_q[p * th:(p + 1) * th, :],
                 preferred_element_type=jnp.float32)
         for p in range(3)], axis=0)                            # (3*tH, tW)

    # Inverse DCT, column pass (fused across planes): T2 @ A_W
    rec = jnp.dot(t2, aw, preferred_element_type=jnp.float32)   # (3*tH, tW)

    y_r = rec[0 * th:1 * th, :] + 128.0
    cb_r = rec[1 * th:2 * th, :]
    cr_r = rec[2 * th:3 * th, :]

    # YCbCr -> RGB
    r_out = y_r + 1.402 * cr_r
    g_out = y_r - 0.344136286 * cb_r - 0.714136286 * cr_r
    b_out = y_r + 1.772 * cb_r

    def to_u8(v):
        # Keep the round-then-clip order; go through int32 (exact for [0,255]).
        return jnp.clip(jnp.round(v), 0.0, 255.0).astype(jnp.int32).astype(jnp.uint8)

    out_ref[0, 0] = to_u8(r_out)
    out_ref[0, 1] = to_u8(g_out)
    out_ref[0, 2] = to_u8(b_out)


# ---------------------------------------------------------------------------
# Wrapper (quality scaling, tile-sized quant maps, pallas_call)
# ---------------------------------------------------------------------------

def _scaled_qtables(quality: jnp.ndarray):
    """libjpeg quality scaling.  quality: (B,) -> (luma, chroma) each (B,8,8)."""
    q = jnp.clip(quality.astype(jnp.float32), 1.0, 100.0)
    scale = jnp.where(q < 50.0, 5000.0 / q, 200.0 - 2.0 * q)  # (B,)

    def scale_tab(tab):
        t = jnp.floor((tab[None, :, :] * scale[:, None, None] + 50.0) / 100.0)
        return jnp.clip(t, 1.0, 255.0)

    return scale_tab(jnp.asarray(_Q_LUMA)), scale_tab(jnp.asarray(_Q_CHROMA))


def jpeg_coding(image_rgb: jnp.ndarray, compression_strength: jnp.ndarray) -> jnp.ndarray:
    """JPEG-code a batch of RGB images.

    Args:
      image_rgb: [B, 3, H, W] pixel values in [0, 255], H % 8 == W % 8 == 0.
      compression_strength: [B] JPEG quality (1..100).

    Returns:
      uint8 [B, 3, H, W] JPEG round-tripped images.
    """
    assert image_rgb.ndim == 4 and image_rgb.shape[1] == 3
    assert compression_strength.ndim == 1
    assert image_rgb.shape[0] == compression_strength.shape[0]
    B, _, H, W = image_rgb.shape
    assert H % 8 == 0 and W % 8 == 0

    image_rgb = image_rgb.astype(jnp.float32)

    # Spatial tile sizes: lane dim a multiple of 128 (or full W), sublane dim
    # a multiple of 32 (or full H); capped at the v6e/v7x-native 256.
    tH = _pick_tile(H, 256, 32)
    tW = _pick_tile(W, 256, 128)
    grid = (B, H // tH, W // tW)

    # Per-batch quality-scaled quant tables, tiled to one spatial tile and
    # row-stacked as [luma; chroma; chroma] to match the kernel layout.
    q_luma, q_chroma = _scaled_qtables(compression_strength)       # (B,8,8)
    q_luma_t = jnp.tile(q_luma, (1, tH // 8, tW // 8))              # (B,tH,tW)
    q_chroma_t = jnp.tile(q_chroma, (1, tH // 8, tW // 8))          # (B,tH,tW)
    qmap = jnp.concatenate([q_luma_t, q_chroma_t, q_chroma_t], axis=1)  # (B,3*tH,tW)
    rqmap = 1.0 / qmap

    # Tile-sized block-diagonal DCT matrices and their transposes.
    a_h = jnp.asarray(_block_diag_dct(tH))                          # (tH,tH)
    a_w = jnp.asarray(_block_diag_dct(tW))                          # (tW,tW)
    a_h_t = a_h.T
    a_w_t = a_w.T

    out = pl.pallas_call(
        _jpeg_kernel,
        out_shape=jax.ShapeDtypeStruct((B, 3, H, W), jnp.uint8),
        grid_spec=pltpu.PrefetchScalarGridSpec(
            num_scalar_prefetch=0,
            grid=grid,
            in_specs=[
                pl.BlockSpec((1, 3, tH, tW), lambda b, i, j: (b, 0, i, j)),
                pl.BlockSpec((1, 3 * tH, tW), lambda b, i, j: (b, 0, 0)),
                pl.BlockSpec((1, 3 * tH, tW), lambda b, i, j: (b, 0, 0)),
                pl.BlockSpec((tH, tH), lambda b, i, j: (0, 0)),
                pl.BlockSpec((tH, tH), lambda b, i, j: (0, 0)),
                pl.BlockSpec((tW, tW), lambda b, i, j: (0, 0)),
                pl.BlockSpec((tW, tW), lambda b, i, j: (0, 0)),
            ],
            out_specs=pl.BlockSpec((1, 3, tH, tW), lambda b, i, j: (b, 0, i, j)),
        ),
        compiler_params=pltpu.CompilerParams(
            dimension_semantics=("parallel", "parallel", "parallel"),
            vmem_limit_bytes=32 * 1024 * 1024,
        ),
    )(image_rgb, qmap, rqmap, a_h, a_h_t, a_w, a_w_t)

    return out


class JPEGCoding:
    """JAX/Pallas port of the PyTorch JPEGCoding module (no parameters)."""

    def __call__(self, image_rgb: jnp.ndarray,
                 compression_strength: jnp.ndarray) -> jnp.ndarray:
        return jpeg_coding(image_rgb, compression_strength)


if __name__ == "__main__":
    key = jax.random.PRNGKey(0)
    B, C, H, W = 2, 3, 16, 16
    k1, _ = jax.random.split(key)
    # uint8-like pixel values in [0, 255]
    image_rgb = jnp.round(
        jax.random.uniform(k1, (B, C, H, W), minval=0.0, maxval=255.0)
    ).astype(jnp.float32)
    compression_strength = jnp.array([50.0, 90.0], dtype=jnp.float32)

    module = JPEGCoding()
    out = module(image_rgb, compression_strength)
    out = jax.block_until_ready(out)
    assert out.shape == (B, C, H, W) and out.dtype == jnp.uint8
    print("KERNEL_OK")
</pallas_src>

<mosaic_0001>
module attributes {stable_mosaic.version = 11 : i64} {
  func.func @_jpeg_kernel(%arg0: i32, %arg1: i32, %arg2: i32, %arg3: memref<1x3x16x16xf32, #tpu.memory_space<vmem>>, %arg4: memref<1x48x16xf32, #tpu.memory_space<vmem>>, %arg5: memref<1x48x16xf32, #tpu.memory_space<vmem>>, %arg6: memref<16x16xf32, #tpu.memory_space<vmem>>, %arg7: memref<16x16xf32, #tpu.memory_space<vmem>>, %arg8: memref<16x16xf32, #tpu.memory_space<vmem>>, %arg9: memref<16x16xf32, #tpu.memory_space<vmem>>, %arg10: memref<1x3x16x16xi8, #tpu.memory_space<vmem>>) attributes {dimension_semantics = [#tpu.dimension_semantics<parallel>, #tpu.dimension_semantics<parallel>, #tpu.dimension_semantics<parallel>], iteration_bounds = array<i64: 2, 1, 1>, scalar_prefetch = 0 : i64, scratch_operands = 0 : i64, tpu.core_type = #tpu.core_type<tc>, window_params = [{transform_indices = @transform_0, window_bounds = array<i64: 1, 3, 16, 16>}, {transform_indices = @transform_1, window_bounds = array<i64: 1, 48, 16>}, {transform_indices = @transform_2, window_bounds = array<i64: 1, 48, 16>}, {pipeline_mode = #tpu.pipeline_mode<synchronous>, transform_indices = @transform_3, window_bounds = array<i64: 16, 16>}, {pipeline_mode = #tpu.pipeline_mode<synchronous>, transform_indices = @transform_4, window_bounds = array<i64: 16, 16>}, {pipeline_mode = #tpu.pipeline_mode<synchronous>, transform_indices = @transform_5, window_bounds = array<i64: 16, 16>}, {pipeline_mode = #tpu.pipeline_mode<synchronous>, transform_indices = @transform_6, window_bounds = array<i64: 16, 16>}, {transform_indices = @transform_7, window_bounds = array<i64: 1, 3, 16, 16>}]} {
    %c0 = arith.constant 0 : index
    %c0_0 = arith.constant 0 : index
    %c0_1 = arith.constant 0 : index
    %c0_2 = arith.constant 0 : index
    %0 = vector.load %arg3[%c0, %c0_0, %c0_1, %c0_2] : memref<1x3x16x16xf32, #tpu.memory_space<vmem>>, vector<1x1x16x16xf32>
    %1 = vector.shape_cast %0 : vector<1x1x16x16xf32> to vector<16x16xf32>
    %c0_3 = arith.constant 0 : index
    %c1 = arith.constant 1 : index
    %c0_4 = arith.constant 0 : index
    %c0_5 = arith.constant 0 : index
    %2 = vector.load %arg3[%c0_3, %c1, %c0_4, %c0_5] : memref<1x3x16x16xf32, #tpu.memory_space<vmem>>, vector<1x1x16x16xf32>
    %3 = vector.shape_cast %2 : vector<1x1x16x16xf32> to vector<16x16xf32>
    %c0_6 = arith.constant 0 : index
    %c2 = arith.constant 2 : index
    %c0_7 = arith.constant 0 : index
    %c0_8 = arith.constant 0 : index
    %4 = vector.load %arg3[%c0_6, %c2, %c0_7, %c0_8] : memref<1x3x16x16xf32, #tpu.memory_space<vmem>>, vector<1x1x16x16xf32>
    %5 = vector.shape_cast %4 : vector<1x1x16x16xf32> to vector<16x16xf32>
    %cst = arith.constant 2.990000e-01 : f32
    %6 = vector.broadcast %cst : f32 to vector<16x16xf32>
    %7 = arith.mulf %6, %1 : vector<16x16xf32>
    %cst_9 = arith.constant 5.870000e-01 : f32
    %8 = vector.broadcast %cst_9 : f32 to vector<16x16xf32>
    %9 = arith.mulf %8, %3 : vector<16x16xf32>
    %10 = arith.addf %7, %9 : vector<16x16xf32>
    %cst_10 = arith.constant 1.140000e-01 : f32
    %11 = vector.broadcast %cst_10 : f32 to vector<16x16xf32>
    %12 = arith.mulf %11, %5 : vector<16x16xf32>
    %13 = arith.addf %10, %12 : vector<16x16xf32>
    %cst_11 = arith.constant 1.280000e+02 : f32
    %14 = vector.broadcast %cst_11 : f32 to vector<16x16xf32>
    %15 = arith.subf %13, %14 : vector<16x16xf32>
    %cst_12 = arith.constant -0.168735892 : f32
    %16 = vector.broadcast %cst_12 : f32 to vector<16x16xf32>
    %17 = arith.mulf %16, %1 : vector<16x16xf32>
    %cst_13 = arith.constant 0.331264108 : f32
    %18 = vector.broadcast %cst_13 : f32 to vector<16x16xf32>
    %19 = arith.mulf %18, %3 : vector<16x16xf32>
    %20 = arith.subf %17, %19 : vector<16x16xf32>
    %cst_14 = arith.constant 5.000000e-01 : f32
    %21 = vector.broadcast %cst_14 : f32 to vector<16x16xf32>
    %22 = arith.mulf %21, %5 : vector<16x16xf32>
    %23 = arith.addf %20, %22 : vector<16x16xf32>
    %cst_15 = arith.constant 5.000000e-01 : f32
    %24 = vector.broadcast %cst_15 : f32 to vector<16x16xf32>
    %25 = arith.mulf %24, %1 : vector<16x16xf32>
    %cst_16 = arith.constant 0.418687582 : f32
    %26 = vector.broadcast %cst_16 : f32 to vector<16x16xf32>
    %27 = arith.mulf %26, %3 : vector<16x16xf32>
    %28 = arith.subf %25, %27 : vector<16x16xf32>
    %cst_17 = arith.constant 0.0813124105 : f32
    %29 = vector.broadcast %cst_17 : f32 to vector<16x16xf32>
    %30 = arith.mulf %29, %5 : vector<16x16xf32>
    %31 = arith.subf %28, %30 : vector<16x16xf32>
    %32 = tpu.concatenate %15, %23, %31 in 0 : vector<16x16xf32>, vector<16x16xf32>, vector<16x16xf32> -> vector<48x16xf32>
    %c0_18 = arith.constant 0 : index
    %c0_19 = arith.constant 0 : index
    %33 = vector.load %arg6[%c0_18, %c0_19] : memref<16x16xf32, #tpu.memory_space<vmem>>, vector<16x16xf32>
    %c0_20 = arith.constant 0 : index
    %c0_21 = arith.constant 0 : index
    %34 = vector.load %arg7[%c0_20, %c0_21] : memref<16x16xf32, #tpu.memory_space<vmem>>, vector<16x16xf32>
    %c0_22 = arith.constant 0 : index
    %c0_23 = arith.constant 0 : index
    %35 = vector.load %arg8[%c0_22, %c0_23] : memref<16x16xf32, #tpu.memory_space<vmem>>, vector<16x16xf32>
    %c0_24 = arith.constant 0 : index
    %c0_25 = arith.constant 0 : index
    %36 = vector.load %arg9[%c0_24, %c0_25] : memref<16x16xf32, #tpu.memory_space<vmem>>, vector<16x16xf32>
    %cst_26 = arith.constant dense<0.000000e+00> : vector<48x16xf32>
    %37 = tpu.matmul %32, %36, %cst_26 {dimension_numbers = #tpu.dot_dimension_numbers<[1], [0], [0], [1], [0, 0, 1, 1], [], []>} : vector<48x16xf32>, vector<16x16xf32>, vector<48x16xf32> -> vector<48x16xf32>
    %38 = vector.extract_strided_slice %37 {offsets = [0, 0], sizes = [16, 16], strides = [1, 1]} : vector<48x16xf32> to vector<16x16xf32>
    %cst_27 = arith.constant dense<0.000000e+00> : vector<16x16xf32>
    %39 = tpu.matmul %33, %38, %cst_27 {dimension_numbers = #tpu.dot_dimension_numbers<[1], [0], [0], [1], [0, 0, 1, 1], [], []>} : vector<16x16xf32>, vector<16x16xf32>, vector<16x16xf32> -> vector<16x16xf32>
    %40 = vector.extract_strided_slice %37 {offsets = [16, 0], sizes = [16, 16], strides = [1, 1]} : vector<48x16xf32> to vector<16x16xf32>
    %cst_28 = arith.constant dense<0.000000e+00> : vector<16x16xf32>
    %41 = tpu.matmul %33, %40, %cst_28 {dimension_numbers = #tpu.dot_dimension_numbers<[1], [0], [0], [1], [0, 0, 1, 1], [], []>} : vector<16x16xf32>, vector<16x16xf32>, vector<16x16xf32> -> vector<16x16xf32>
    %42 = vector.extract_strided_slice %37 {offsets = [32, 0], sizes = [16, 16], strides = [1, 1]} : vector<48x16xf32> to vector<16x16xf32>
    %cst_29 = arith.constant dense<0.000000e+00> : vector<16x16xf32>
    %43 = tpu.matmul %33, %42, %cst_29 {dimension_numbers = #tpu.dot_dimension_numbers<[1], [0], [0], [1], [0, 0, 1, 1], [], []>} : vector<16x16xf32>, vector<16x16xf32>, vector<16x16xf32> -> vector<16x16xf32>
    %44 = tpu.concatenate %39, %41, %43 in 0 : vector<16x16xf32>, vector<16x16xf32>, vector<16x16xf32> -> vector<48x16xf32>
    %c0_30 = arith.constant 0 : index
    %c0_31 = arith.constant 0 : index
    %c0_32 = arith.constant 0 : index
    %45 = vector.load %arg5[%c0_30, %c0_31, %c0_32] : memref<1x48x16xf32, #tpu.memory_space<vmem>>, vector<1x48x16xf32>
    %46 = vector.shape_cast %45 : vector<1x48x16xf32> to vector<48x16xf32>
    %47 = arith.mulf %44, %46 : vector<48x16xf32>
    %48 = math.roundeven %47 : vector<48x16xf32>
    %c0_33 = arith.constant 0 : index
    %c0_34 = arith.constant 0 : index
    %c0_35 = arith.constant 0 : index
    %49 = vector.load %arg4[%c0_33, %c0_34, %c0_35] : memref<1x48x16xf32, #tpu.memory_space<vmem>>, vector<1x48x16xf32>
    %50 = vector.shape_cast %49 : vector<1x48x16xf32> to vector<48x16xf32>
    %51 = arith.mulf %48, %50 : vector<48x16xf32>
    %52 = vector.extract_strided_slice %51 {offsets = [0, 0], sizes = [16, 16], strides = [1, 1]} : vector<48x16xf32> to vector<16x16xf32>
    %cst_36 = arith.constant dense<0.000000e+00> : vector<16x16xf32>
    %53 = tpu.matmul %34, %52, %cst_36 {dimension_numbers = #tpu.dot_dimension_numbers<[1], [0], [0], [1], [0, 0, 1, 1], [], []>} : vector<16x16xf32>, vector<16x16xf32>, vector<16x16xf32> -> vector<16x16xf32>
    %54 = vector.extract_strided_slice %51 {offsets = [16, 0], sizes = [16, 16], strides = [1, 1]} : vector<48x16xf32> to vector<16x16xf32>
    %cst_37 = arith.constant dense<0.000000e+00> : vector<16x16xf32>
    %55 = tpu.matmul %34, %54, %cst_37 {dimension_numbers = #tpu.dot_dimension_numbers<[1], [0], [0], [1], [0, 0, 1, 1], [], []>} : vector<16x16xf32>, vector<16x16xf32>, vector<16x16xf32> -> vector<16x16xf32>
    %56 = vector.extract_strided_slice %51 {offsets = [32, 0], sizes = [16, 16], strides = [1, 1]} : vector<48x16xf32> to vector<16x16xf32>
    %cst_38 = arith.constant dense<0.000000e+00> : vector<16x16xf32>
    %57 = tpu.matmul %34, %56, %cst_38 {dimension_numbers = #tpu.dot_dimension_numbers<[1], [0], [0], [1], [0, 0, 1, 1], [], []>} : vector<16x16xf32>, vector<16x16xf32>, vector<16x16xf32> -> vector<16x16xf32>
    %58 = tpu.concatenate %53, %55, %57 in 0 : vector<16x16xf32>, vector<16x16xf32>, vector<16x16xf32> -> vector<48x16xf32>
    %cst_39 = arith.constant dense<0.000000e+00> : vector<48x16xf32>
    %59 = tpu.matmul %58, %35, %cst_39 {dimension_numbers = #tpu.dot_dimension_numbers<[1], [0], [0], [1], [0, 0, 1, 1], [], []>} : vector<48x16xf32>, vector<16x16xf32>, vector<48x16xf32> -> vector<48x16xf32>
    %60 = vector.extract_strided_slice %59 {offsets = [0, 0], sizes = [16, 16], strides = [1, 1]} : vector<48x16xf32> to vector<16x16xf32>
    %cst_40 = arith.constant 1.280000e+02 : f32
    %61 = vector.broadcast %cst_40 : f32 to vector<16x16xf32>
    %62 = arith.addf %60, %61 : vector<16x16xf32>
    %63 = vector.extract_strided_slice %59 {offsets = [16, 0], sizes = [16, 16], strides = [1, 1]} : vector<48x16xf32> to vector<16x16xf32>
    %64 = vector.extract_strided_slice %59 {offsets = [32, 0], sizes = [16, 16], strides = [1, 1]} : vector<48x16xf32> to vector<16x16xf32>
    %cst_41 = arith.constant 1.402000e+00 : f32
    %65 = vector.broadcast %cst_41 : f32 to vector<16x16xf32>
    %66 = arith.mulf %65, %64 : vector<16x16xf32>
    %67 = arith.addf %62, %66 : vector<16x16xf32>
    %cst_42 = arith.constant 0.344136298 : f32
    %68 = vector.broadcast %cst_42 : f32 to vector<16x16xf32>
    %69 = arith.mulf %68, %63 : vector<16x16xf32>
    %70 = arith.subf %62, %69 : vector<16x16xf32>
    %cst_43 = arith.constant 0.714136302 : f32
    %71 = vector.broadcast %cst_43 : f32 to vector<16x16xf32>
    %72 = arith.mulf %71, %64 : vector<16x16xf32>
    %73 = arith.subf %70, %72 : vector<16x16xf32>
    %cst_44 = arith.constant 1.772000e+00 : f32
    %74 = vector.broadcast %cst_44 : f32 to vector<16x16xf32>
    %75 = arith.mulf %74, %63 : vector<16x16xf32>
    %76 = arith.addf %62, %75 : vector<16x16xf32>
    %77 = math.roundeven %67 : vector<16x16xf32>
    %cst_45 = arith.constant 0.000000e+00 : f32
    %cst_46 = arith.constant 2.550000e+02 : f32
    %78 = vector.broadcast %cst_45 : f32 to vector<16x16xf32>
    %79 = arith.maximumf %78, %77 : vector<16x16xf32>
    %80 = vector.broadcast %cst_46 : f32 to vector<16x16xf32>
    %81 = arith.minimumf %80, %79 : vector<16x16xf32>
    %82 = arith.fptosi %81 : vector<16x16xf32> to vector<16x16xi32>
    %83 = arith.trunci %82 : vector<16x16xi32> to vector<16x16xi8>
    %c0_47 = arith.constant 0 : index
    %c0_48 = arith.constant 0 : index
    %c0_49 = arith.constant 0 : index
    %c0_50 = arith.constant 0 : index
    %84 = vector.load %arg10[%c0_47, %c0_48, %c0_49, %c0_50] : memref<1x3x16x16xi8, #tpu.memory_space<vmem>>, vector<1x1x16x16xi8>
    %85 = vector.shape_cast %84 : vector<1x1x16x16xi8> to vector<16x16xi8>
    %86 = vector.shape_cast %83 : vector<16x16xi8> to vector<1x1x16x16xi8>
    tpu.vector_store %arg10[%c0_47, %c0_48, %c0_49, %c0_50], %86 {strides = array<i32>} : memref<1x3x16x16xi8, #tpu.memory_space<vmem>>, vector<1x1x16x16xi8>,
    %87 = math.roundeven %73 : vector<16x16xf32>
    %cst_51 = arith.constant 0.000000e+00 : f32
    %cst_52 = arith.constant 2.550000e+02 : f32
    %88 = vector.broadcast %cst_51 : f32 to vector<16x16xf32>
    %89 = arith.maximumf %88, %87 : vector<16x16xf32>
    %90 = vector.broadcast %cst_52 : f32 to vector<16x16xf32>
    %91 = arith.minimumf %90, %89 : vector<16x16xf32>
    %92 = arith.fptosi %91 : vector<16x16xf32> to vector<16x16xi32>
    %93 = arith.trunci %92 : vector<16x16xi32> to vector<16x16xi8>
    %c0_53 = arith.constant 0 : index
    %c1_54 = arith.constant 1 : index
    %c0_55 = arith.constant 0 : index
    %c0_56 = arith.constant 0 : index
    %94 = vector.load %arg10[%c0_53, %c1_54, %c0_55, %c0_56] : memref<1x3x16x16xi8, #tpu.memory_space<vmem>>, vector<1x1x16x16xi8>
    %95 = vector.shape_cast %94 : vector<1x1x16x16xi8> to vector<16x16xi8>
    %96 = vector.shape_cast %93 : vector<16x16xi8> to vector<1x1x16x16xi8>
    tpu.vector_store %arg10[%c0_53, %c1_54, %c0_55, %c0_56], %96 {strides = array<i32>} : memref<1x3x16x16xi8, #tpu.memory_space<vmem>>, vector<1x1x16x16xi8>,
    %97 = math.roundeven %76 : vector<16x16xf32>
    %cst_57 = arith.constant 0.000000e+00 : f32
    %cst_58 = arith.constant 2.550000e+02 : f32
    %98 = vector.broadcast %cst_57 : f32 to vector<16x16xf32>
    %99 = arith.maximumf %98, %97 : vector<16x16xf32>
    %100 = vector.broadcast %cst_58 : f32 to vector<16x16xf32>
    %101 = arith.minimumf %100, %99 : vector<16x16xf32>
    %102 = arith.fptosi %101 : vector<16x16xf32> to vector<16x16xi32>
    %103 = arith.trunci %102 : vector<16x16xi32> to vector<16x16xi8>
    %c0_59 = arith.constant 0 : index
    %c2_60 = arith.constant 2 : index
    %c0_61 = arith.constant 0 : index
    %c0_62 = arith.constant 0 : index
    %104 = vector.load %arg10[%c0_59, %c2_60, %c0_61, %c0_62] : memref<1x3x16x16xi8, #tpu.memory_space<vmem>>, vector<1x1x16x16xi8>
    %105 = vector.shape_cast %104 : vector<1x1x16x16xi8> to vector<16x16xi8>
    %106 = vector.shape_cast %103 : vector<16x16xi8> to vector<1x1x16x16xi8>
    tpu.vector_store %arg10[%c0_59, %c2_60, %c0_61, %c0_62], %106 {strides = array<i32>} : memref<1x3x16x16xi8, #tpu.memory_space<vmem>>, vector<1x1x16x16xi8>,
    return
  }
  func.func @transform_0(%arg0: i32, %arg1: i32, %arg2: i32) -> (i32, i32, i32, i32) {
    %c0_i32 = arith.constant 0 : i32
    %c0_i32_0 = arith.constant 0 : i32
    return %arg0, %c0_i32, %arg1, %arg2 : i32, i32, i32, i32
  }
  func.func @transform_1(%arg0: i32, %arg1: i32, %arg2: i32) -> (i32, i32, i32) {
    %c0_i32 = arith.constant 0 : i32
    %c0_i32_0 = arith.constant 0 : i32
    %c0_i32_1 = arith.constant 0 : i32
    return %arg0, %c0_i32, %c0_i32_0 : i32, i32, i32
  }
  func.func @transform_2(%arg0: i32, %arg1: i32, %arg2: i32) -> (i32, i32, i32) {
    %c0_i32 = arith.constant 0 : i32
    %c0_i32_0 = arith.constant 0 : i32
    %c0_i32_1 = arith.constant 0 : i32
    return %arg0, %c0_i32, %c0_i32_0 : i32, i32, i32
  }
  func.func @transform_3(%arg0: i32, %arg1: i32, %arg2: i32) -> (i32, i32) {
    %c0_i32 = arith.constant 0 : i32
    %c0_i32_0 = arith.constant 0 : i32
    %c0_i32_1 = arith.constant 0 : i32
    return %c0_i32, %c0_i32_0 : i32, i32
  }
  func.func @transform_4(%arg0: i32, %arg1: i32, %arg2: i32) -> (i32, i32) {
    %c0_i32 = arith.constant 0 : i32
    %c0_i32_0 = arith.constant 0 : i32
    %c0_i32_1 = arith.constant 0 : i32
    return %c0_i32, %c0_i32_0 : i32, i32
  }
  func.func @transform_5(%arg0: i32, %arg1: i32, %arg2: i32) -> (i32, i32) {
    %c0_i32 = arith.constant 0 : i32
    %c0_i32_0 = arith.constant 0 : i32
    %c0_i32_1 = arith.constant 0 : i32
    return %c0_i32, %c0_i32_0 : i32, i32
  }
  func.func @transform_6(%arg0: i32, %arg1: i32, %arg2: i32) -> (i32, i32) {
    %c0_i32 = arith.constant 0 : i32
    %c0_i32_0 = arith.constant 0 : i32
    %c0_i32_1 = arith.constant 0 : i32
    return %c0_i32, %c0_i32_0 : i32, i32
  }
  func.func @transform_7(%arg0: i32, %arg1: i32, %arg2: i32) -> (i32, i32, i32, i32) {
    %c0_i32 = arith.constant 0 : i32
    %c0_i32_0 = arith.constant 0 : i32
    return %arg0, %c0_i32, %arg1, %arg2 : i32, i32, i32, i32
  }
}

</mosaic_0001>

<bundles_post_ra>
// kernel: tpu_custom_call.1
= control target key start
LH: loop header
LB: loop body
LE: loop exit
PB: predicated region body
PF: predicated region fallthrough
CT: control target
= control target key end

     0   :  { %12 = vsyncpa [#allocation3], 0  ;;  %s1397_s0 = inlined_call_operand.vmem [shape: f32[2,3,16,16], index: 0, kind: input, shape index: {}]   ;;  %s1398_s1 = inlined_call_operand.vmem [shape: f32[2,48,16], index: 1, kind: input, shape index: {}]   ;;  %s1399_s2 = inlined_call_operand.vmem [shape: f32[2,48,16], index: 2, kind: input, shape index: {}]   ;;  %s1400_s3 = inlined_call_operand.vmem [shape: f32[16,16], index: 3, kind: input, shape index: {}]   ;;  %s1401_s4 = inlined_call_operand.vmem [shape: f32[16,16], index: 4, kind: input, shape index: {}]   ;;  %s1402_s5 = inlined_call_operand.vmem [shape: f32[16,16], index: 5, kind: input, shape index: {}]   ;;  %s1403_s6 = inlined_call_operand.vmem [shape: f32[16,16], index: 6, kind: input, shape index: {}]   ;;  %s1404_s7 = inlined_call_operand.hbm [shape: u8[2,3,16,16], index: 7, kind: output, shape index: {}]  }
   0x1   :  { %14 = vsyncpa [#allocation3 + $0x1], 0  ;;  %s1206_s24 = smov 0   ;;  %s1208_s25 = smov 0  }
   0x2   :  { %s1210_s26 = smov 0   ;;  %s1212_s27 = smov 0  }
   0x3   :  { %s1214_s28 = smov 0   ;;  %s1216_s29 = smov 0  }
   0x4 LB: > { %s895_s30 = sadd.s32 4294967295, %s1162_s29   ;;  %s896_s8 = sadd.s32 4294967294, %s1162_s29   ;;  %s1162_s29 = sphi %s1216_s29, %s20_s29   ;;  %s1158_s28 = sphi %s1214_s28, %s1411_s28   ;;  %s1154_s27 = sphi %s1212_s27, %s1410_s27   ;;  %s1150_s26 = sphi %s1210_s26, %s1409_s26   ;;  %s1146_s25 = sphi %s1208_s25, %s1408_s25   ;;  %s1142_s24 = sphi %s1206_s24, %s1407_s24  }
   0x5   : > { %s39_s9 = sadd.s32 1, %s1158_s28  ;;  %s216_s10 = sadd.s32 1, %s1150_s26 }
   0x6   : > { %p41_p0 = scmp.ge.s32.totalorder %s39_s9, 2  ;;  %p226_p1 = scmp.ne.s32.totalorder %s1150_s26, %s1146_s25 }
   0x7   : > { %p227_p2 = scmp.eq.s32.totalorder %s895_s30, 1  ;;  %p232_p3 = scmp.ne.s32.totalorder %s1146_s25, %s1142_s24 }
   0x8   : > { %s1413_s9 = smov (%p41_p0, %s39_s9), 0  ;;  %p233_p5 = scmp.eq.s32.totalorder %s896_s8, 1 }
   0x9   : > { %p1246_p4 = por %p227_p2, %p226_p1  ;;  %s209_s12 = ssub.s32 %s1158_s28, %s1413_s9 }
   0xa   : > { %p899_p6 = scmp.ge.s32.totalorder %s1162_s29, 1  ;;  %p214_p7 = scmp.eq.s32.totalorder %s209_s12, 0 }
   0xb   : > { %p1253_p8 = por %p233_p5, %p232_p3  ;;  %p295_p9 = scmp.lt.s32.totalorder %s1162_s29, 3 }
   0xc   : > { %s1259_s14 = scalar_select %p214_p7, %s1150_s26, %s216_s10  }
   0xd   : > { %p296_p10 = pnand %p899_p6, %p295_p9 }
   0xe   : > { %p345_p11 = scmp.lt.s32.totalorder (!%p296_p10), %s1154_s27, 1  ;;  %s341_s16 = sand.u32 (!%p296_p10), 1, %s1146_s25  }
   0xf   : > { %299 = sbr.rel (%p296_p10) target bundleno = 644 (0x284), region = 48  ;;  %s767_s30 = scalar_lea.sflag (!%p296_p10), [#allocation3], %s341_s16 }
  0x14   : > { %v415_v0 = vld [vmem:[%s1403_s6 + $0x8] sm:$0xff]  ;;  %v414_v1 = vld [vmem:[%s1403_s6] sm:$0xff]  ;;  %s346_s19 = scalar_select %p345_p11, %s1154_s27, 1  ;;  %vm416_vm0 = vcmask 130048   ;;  %vm733_vm7 = vcmask 123904  }
  0x15   : > { %449 = vmatpush.msra.mxu0 %v415_v0  ;;  %v408_v42 = vld [vmem:[%s1400_s3] sm:$0xff]  ;;  %v409_v44 = vld [vmem:[%s1400_s3 + $0x8] sm:$0xff] }
  0x16   : > { %s1269_s20 = smul.u32 48, %s346_s19 }
  0x17   : > { %450 = vmatpush.msra.mxu0 %v414_v1  ;;  %s1026_s19 = smul.u32 12, %s1154_s27 }
  0x18   : > { %s355_s23 = scalar_lea.vmem %s1397_s0, %s1269_s20  ;;  %s1297_s17 = scalar_lea.vmem %s1399_s2, %s1269_s20 }
  0x19   : > { %v368_v2 = vld [vmem:[%s355_s23] sm:$0xff]  ;;  %v903_v3 = vld [vmem:[%s355_s23 + $0x10] sm:$0xff]  ;;  %v369_v8 = vld [vmem:[%s355_s23 + $0x8] sm:$0xff]  ;;  %s1306_s21 = scalar_lea.vmem %s1398_s1, %s1269_s20 }
  0x1a   : > { %v905_v4 = vld [vmem:[%s355_s23 + $0x20] sm:$0xff]  ;;  %v376_v5 = vmul.f32 0.299, %v368_v2  ;;  %v378_v6 = vmul.f32 0.587, %v903_v3  ;;  %v904_v9 = vld [vmem:[%s355_s23 + $0x18] sm:$0xff] }
  0x1b   : > { %v382_v7 = vmul.f32 0.114, %v905_v4  ;;  %v906_v10 = vld [vmem:[%s355_s23 + $0x28] sm:$0xff]  ;;  %v377_v12 = vmul.f32 0.299, %v369_v8  ;;  %v394_v23 = vmul.f32 0.5, %v905_v4  ;;  %s781_s23 = scalar_lea.hbm %s1404_s7, %s1026_s19 }
  0x1c   : > { %v380_v11 = vadd.f32 %v378_v6, %v376_v5  ;;  %v379_v13 = vmul.f32 0.587, %v904_v9  ;;  %v383_v16 = vmul.f32 0.114, %v906_v10  ;;  %v388_v20 = vmul.f32 -0.16873589, %v368_v2 }
  0x1d   : > { %v390_v21 = vmul.f32 0.3312641, %v903_v3  ;;  %v389_v25 = vmul.f32 -0.16873589, %v369_v8  ;;  %v391_v26 = vmul.f32 0.3312641, %v904_v9 }
  0x1e   : > { %v384_v14 = vadd.f32 %v382_v7, %v380_v11  ;;  %v381_v15 = vadd.f32 %v379_v13, %v377_v12  ;;  %v395_v28 = vmul.f32 0.5, %v906_v10  ;;  %v398_v30 = vmul.f32 0.5, %v368_v2  ;;  %v545_v48 = vld [vmem:[%s1297_s17] sm:$0xff]  ;;  %v546_v52 = vld [vmem:[%s1297_s17 + $0x8] sm:$0xff]  ;;  %v547_v60 = vld [vmem:[%s1297_s17 + $0x10] sm:$0xff]  ;;  %s784_s20 = sshll.u32 %s781_s23, 4  ;;  %s785_s20 = int_to_ptr.hbm [resolvable:$true] %s784_s20 }
  0x1f   : > { %v392_v22 = vsub.f32 %v388_v20, %v390_v21  ;;  %v393_v27 = vsub.f32 %v389_v25, %v391_v26  ;;  %v400_v31 = vmul.f32 0.41868758, %v903_v3  ;;  %v404_v33 = vmul.f32 0.08131241, %v905_v4  ;;  %v564_v5 = vld [vmem:[%s1306_s21 + $0x8] sm:$0xff]  ;;  %v548_v11 = vld [vmem:[%s1297_s17 + $0x18] sm:$0xff] }
  0x20   : > { %v907_v17 = vadd.f32 -128.0, %v384_v14  ;;  %v385_v18 = vadd.f32 %v383_v16, %v381_v15  ;;  %v399_v35 = vmul.f32 0.5, %v369_v8  ;;  %v401_v36 = vmul.f32 0.41868758, %v904_v9  ;;  %v563_v9 = vld [vmem:[%s1306_s21] sm:$0xff]  ;;  %s1098_s8 = sshra.s32 %s785_s20, 4  ;;  %s1099_s8 = int_to_ptr.hbm [resolvable:$true] %s1098_s8 }
  0x21   : > { %v396_v24 = vadd.f32 %v394_v23, %v392_v22  ;;  %v397_v29 = vadd.f32 %v395_v28, %v393_v27  ;;  %v402_v32 = vsub.f32 %v398_v30, %v400_v31  ;;  %v405_v38 = vmul.f32 0.08131241, %v906_v10  ;;  %v410_v13 = vld [vmem:[%s1401_s4] sm:$0xff]  ;;  %v411_v23 = vld [vmem:[%s1401_s4 + $0x8] sm:$0xff]  ;;  %v566_v31 = vld [vmem:[%s1306_s21 + $0x18] sm:$0xff]  ;;  %s1100_s10 = scalar_lea.hbm %s1099_s8, 12  ;;  %p1105_p1 = scmp.lt.s32.totalorder %s1099_s8, %s1404_s7 }
  0x22   : > { %909 = vmatmul.msk.f32.vlgmr.msra.gmra.mxu0 %vm416_vm0, %v907_v17  ;;  %v908_v19 = vadd.f32 -128.0, %v385_v18  ;;  %v403_v37 = vsub.f32 %v399_v35, %v401_v36  ;;  %v549_v22 = vld [vmem:[%s1297_s17 + $0x20] sm:$0xff]  ;;  %v565_v36 = vld [vmem:[%s1306_s21 + $0x10] sm:$0xff]  ;;  %p1101_p12 = scmp.ne.s32.totalorder %s1099_s8, %s1100_s10 }
  0x23   : > { %v406_v34 = vsub.f32 %v402_v32, %v404_v33  ;;  %v413_v32 = vld [vmem:[%s1402_s5 + $0x8] sm:$0xff] }
  0x24   : > { %v407_v39 = vsub.f32 %v403_v37, %v405_v38  ;;  %682 = vmatpush.msra.mxu1 %v413_v32  ;;  %v550_v38 = vld [vmem:[%s1297_s17 + $0x28] sm:$0xff]  ;;  %s958_s17 = smul.u32 12, %s341_s16  ;;  %p1102_p13 = pnand %p1101_p12, %p1246_p4 }
  0x26   : > { %s1344_s18 = scalar_lea.vmem [#allocation2], %s958_s17  ;;  %p1103_p0 = pneg %p1102_p13 }
  0x27   : > { %s782_s27 = sshll.u32 %s1344_s18, 4  ;;  %s1104_s17 = scalar_lea.hbm %s1404_s7, 24  ;;  %s783_s27 = int_to_ptr.vmem [resolvable:$true] %s782_s27 }
  0x28   : > { %p1106_p2 = scmp.lt.s32.totalorder %s1104_s17, %s1100_s10 }
  0x2a   : > { %910 = vmatmul.msk.f32.gmra.mxu0 %vm416_vm0, %v908_v19  ;;  %p1107_p3 = por %p1106_p2, %p1105_p1 }
  0x2c   : > { %p1108_p5 = pnand %p1107_p3, %p1103_p0 }
  0x32   : > { %911 = vmatmul.msk.f32.gmra.mxu0 %vm416_vm0, %v396_v24 }
  0x3a   : > { %912 = vmatmul.msk.f32.gmra.mxu0 %vm416_vm0, %v397_v29 }
  0x42   : > { %913 = vmatmul.msk.f32.gmra.mxu0 %vm416_vm0, %v406_v34 }
  0x4a   : > { %914 = vmatmul.msk.f32.gmra.mxu0 %vm416_vm0, %v407_v39 }
  0x9f   : > { %v452_v40 = vpop.f32.mrf.mxu0 }
  0xa7   : > { %v455_v41 = vpop.f32.mrf.mxu0 }
  0xa8   : > { %490 = vmatpush.msra.mxu2 %v455_v41 }
  0xaa   : > { %491 = vmatpush.msra.mxu2 %v452_v40 }
  0xab   : > { %915 = vmatmul.msk.f32.vlgmr.msra.gmra.mxu2 %vm416_vm0, %v408_v42 }
  0xaf   : > { %v458_v43 = vpop.f32.mrf.mxu0 }
  0xb3   : > { %916 = vmatmul.msk.f32.gmra.mxu2 %vm416_vm0, %v409_v44 }
  0xb7   : > { %v461_v45 = vpop.f32.mrf.mxu0 }
  0xb8   : > { %513 = vmatpush.msrb.mxu2 %v461_v45 }
  0xba   : > { %514 = vmatpush.msrb.mxu2 %v458_v43 }
  0xbb   : > { %917 = vmatmul.msk.f32.vlgmr.msrb.gmra.mxu2 %vm416_vm0, %v408_v42 }
  0xbf   : > { %v464_v46 = vpop.f32.mrf.mxu0 }
  0xc3   : > { %918 = vmatmul.msk.f32.gmra.mxu2 %vm416_vm0, %v409_v44 }
  0xc7   : > { %v467_v47 = vpop.f32.mrf.mxu0 }
  0xc8   : > { %536 = vmatpush.msra.mxu3 %v467_v47 }
  0xca   : > { %537 = vmatpush.msra.mxu3 %v464_v46 }
  0xcb   : > { %919 = vmatmul.msk.f32.vlgmr.msra.gmra.mxu3 %vm416_vm0, %v408_v42 }
  0xd3   : > { %920 = vmatmul.msk.f32.gmra.mxu3 %vm416_vm0, %v409_v44 }
 0x12e   : > { %v493_v49 = vpop.f32.mrf.mxu2 }
 0x12f   : > { %v551_v50 = vmul.f32 %v545_v48, %v493_v49 }
 0x131   : > { %v962_v51 = vcvt.f32.s32 %v551_v50  ;;  %v965_v58 = vand.u32 2147483648, %v551_v50  ;;  %v960_v62 = vand.u32 2147483647, %v551_v50 }
 0x133   : > { %v963_v53 = vcvt.s32.f32 %v962_v51  ;;  %vm961_vm2 = vcmp.lt.f32.partialorder %v960_v62, 8388608.0 }
 0x135   : > { %v964_v57 = vand.u32 2147483647, %v963_v53  ;;  %v568_v53 = vld [vmem:[%s1306_s21 + $0x28] sm:$0xff] }
 0x136   : > { %v496_v54 = vpop.f32.mrf.mxu2 }
 0x137   : > { %v552_v55 = vmul.f32 %v546_v52, %v496_v54  ;;  %v966_v1 = vor.u32 %v965_v58, %v964_v57 }
 0x139   : > { %v970_v56 = vcvt.f32.s32 %v552_v55  ;;  %v968_v61 = vand.u32 2147483647, %v552_v55  ;;  %v973_v63 = vand.u32 2147483648, %v552_v55  ;;  %v967_v8 = vsel %vm961_vm2, %v966_v1, %v551_v50 }
 0x13a   : > { %v569_v12 = vmul.f32 %v967_v8, %v563_v9 }
 0x13b   : > { %v971_v59 = vcvt.s32.f32 %v970_v56  ;;  %vm969_vm1 = vcmp.lt.f32.partialorder %v968_v61, 8388608.0  ;;  %v567_v56 = vld [vmem:[%s1306_s21 + $0x20] sm:$0xff] }
 0x13d   : > { %v972_v0 = vand.u32 2147483647, %v971_v59  ;;  %v412_v59 = vld [vmem:[%s1402_s5] sm:$0xff] }
 0x13e   : > { %v516_v2 = vpop.f32.mrf.mxu2  ;;  %683 = vmatpush.msra.mxu1 %v412_v59 }
 0x13f   : > { %v553_v3 = vmul.f32 %v547_v60, %v516_v2  ;;  %v974_v4 = vor.u32 %v973_v63, %v972_v0 }
 0x141   : > { %v978_v6 = vcvt.f32.s32 %v553_v3  ;;  %v975_v7 = vsel %vm969_vm1, %v974_v4, %v552_v55  ;;  %v981_v19 = vand.u32 2147483648, %v553_v3  ;;  %v976_v24 = vand.u32 2147483647, %v553_v3 }
 0x142   : > { %v570_v10 = vmul.f32 %v975_v7, %v564_v5 }
 0x143   : > { %v979_v14 = vcvt.s32.f32 %v978_v6  ;;  %vm977_vm4 = vcmp.lt.f32.partialorder %v976_v24, 8388608.0 }
 0x144   : > { %595 = vmatpush.msrb.mxu3 %v570_v10 }
 0x145   : > { %v980_v17 = vand.u32 2147483647, %v979_v14 }
 0x146   : > { %v519_v15 = vpop.f32.mrf.mxu2  ;;  %596 = vmatpush.msrb.mxu3 %v569_v12 }
 0x147   : > { %v554_v16 = vmul.f32 %v548_v11, %v519_v15  ;;  %921 = vmatmul.msk.f32.vlgmr.msrb.gmra.mxu3 %vm416_vm0, %v410_v13  ;;  %v982_v27 = vor.u32 %v981_v19, %v980_v17 }
 0x149   : > { %v986_v18 = vcvt.f32.s32 %v554_v16  ;;  %v984_v21 = vand.u32 2147483647, %v554_v16  ;;  %v989_v26 = vand.u32 2147483648, %v554_v16  ;;  %v983_v35 = vsel %vm977_vm4, %v982_v27, %v553_v3 }
 0x14a   : > { %v571_v39 = vmul.f32 %v983_v35, %v565_v36 }
 0x14b   : > { %v987_v20 = vcvt.s32.f32 %v986_v18  ;;  %vm985_vm3 = vcmp.lt.f32.partialorder %v984_v21, 8388608.0 }
 0x14d   : > { %v988_v25 = vand.u32 2147483647, %v987_v20 }
 0x14e   : > { %v539_v28 = vpop.f32.mrf.mxu3 }
 0x14f   : > { %v990_v29 = vor.u32 %v989_v26, %v988_v25  ;;  %v555_v30 = vmul.f32 %v549_v22, %v539_v28  ;;  %922 = vmatmul.msk.f32.gmra.mxu3 %vm416_vm0, %v411_v23 }
 0x151   : > { %v994_v33 = vcvt.f32.s32 %v555_v30  ;;  %v991_v34 = vsel %vm985_vm3, %v990_v29, %v554_v16  ;;  %v997_v45 = vand.u32 2147483648, %v555_v30  ;;  %v992_v48 = vand.u32 2147483647, %v555_v30 }
 0x152   : > { %v572_v37 = vmul.f32 %v991_v34, %v566_v31 }
 0x153   : > { %v995_v40 = vcvt.s32.f32 %v994_v33  ;;  %vm993_vm6 = vcmp.lt.f32.partialorder %v992_v48, 8388608.0 }
 0x154   : > { %618 = vmatpush.msra.mxu2 %v572_v37 }
 0x155   : > { %v996_v43 = vand.u32 2147483647, %v995_v40 }
 0x156   : > { %v542_v41 = vpop.f32.mrf.mxu3  ;;  %619 = vmatpush.msra.mxu2 %v571_v39 }
 0x157   : > { %v556_v42 = vmul.f32 %v550_v38, %v542_v41  ;;  %923 = vmatmul.msk.f32.vlgmr.msra.gmra.mxu2 %vm416_vm0, %v410_v13  ;;  %v998_v51 = vor.u32 %v997_v45, %v996_v43 }
 0x159   : > { %v1002_v44 = vcvt.f32.s32 %v556_v42  ;;  %v1000_v47 = vand.u32 2147483647, %v556_v42  ;;  %v1005_v50 = vand.u32 2147483648, %v556_v42  ;;  %v999_v55 = vsel %vm993_vm6, %v998_v51, %v555_v30 }
 0x15a   : > { %v573_v58 = vmul.f32 %v999_v55, %v567_v56 }
 0x15b   : > { %v1003_v46 = vcvt.s32.f32 %v1002_v44  ;;  %vm1001_vm5 = vcmp.lt.f32.partialorder %v1000_v47, 8388608.0 }
 0x15d   : > { %v1004_v49 = vand.u32 2147483647, %v1003_v46 }
 0x15f   : > { %v1006_v52 = vor.u32 %v1005_v50, %v1004_v49  ;;  %924 = vmatmul.msk.f32.gmra.mxu2 %vm416_vm0, %v411_v23 }
 0x161   : > { %v1007_v54 = vsel %vm1001_vm5, %v1006_v52, %v556_v42 }
 0x162   : > { %v574_v57 = vmul.f32 %v1007_v54, %v568_v53 }
 0x164   : > { %641 = vmatpush.msra.mxu3 %v574_v57 }
 0x166   : > { %642 = vmatpush.msra.mxu3 %v573_v58 }
 0x167   : > { %925 = vmatmul.msk.f32.vlgmr.msra.gmra.mxu3 %vm416_vm0, %v410_v13 }
 0x16f   : > { %926 = vmatmul.msk.f32.gmra.mxu3 %vm416_vm0, %v411_v23 }
 0x1ca   : > { %v598_v60 = vpop.f32.mrf.mxu3 }
 0x1cb   : > { %927 = vmatmul.msk.f32.vlgmr.msra.gmra.mxu1 %vm416_vm0, %v598_v60 }
 0x1d2   : > { %v601_v61 = vpop.f32.mrf.mxu3 }
 0x1d3   : > { %928 = vmatmul.msk.f32.gmra.mxu1 %vm416_vm0, %v601_v61 }
 0x1da   : > { %v621_v62 = vpop.f32.mrf.mxu2 }
 0x1db   : > { %929 = vmatmul.msk.f32.gmra.mxu1 %vm416_vm0, %v621_v62 }
 0x1e2   : > { %v624_v63 = vpop.f32.mrf.mxu2 }
 0x1e3   : > { %930 = vmatmul.msk.f32.gmra.mxu1 %vm416_vm0, %v624_v63 }
 0x1ea   : > { %v644_v0 = vpop.f32.mrf.mxu3 }
 0x1eb   : > { %931 = vmatmul.msk.f32.gmra.mxu1 %vm416_vm0, %v644_v0 }
 0x1f2   : > { %v647_v1 = vpop.f32.mrf.mxu3 }
 0x1f3   : > { %932 = vmatmul.msk.f32.gmra.mxu1 %vm416_vm0, %v647_v1 }
 0x248   : > { %v685_v2 = vpop.f32.mrf.mxu1 }
 0x249   : > { %v703_v5 = vadd.f32 128.0, %v685_v2 }
 0x250   : > { %v688_v3 = vpop.f32.mrf.mxu1 }
 0x251   : > { %v704_v11 = vadd.f32 128.0, %v688_v3 }
 0x258   : > { %v691_v4 = vpop.f32.mrf.mxu1 }
 0x259   : > { %v717_v6 = vmul.f32 1.772, %v691_v4  ;;  %v709_v16 = vmul.f32 0.3441363, %v691_v4 }
 0x25b   : > { %v719_v7 = vadd.f32 %v717_v6, %v703_v5  ;;  %v711_v21 = vsub.f32 %v703_v5, %v709_v16 }
 0x25d   : > { %v947_v8 = vmax.f32 %v719_v7, 0.0 }
 0x25f   : > { %v948_v9 = vmin.f32 %v947_v8, 255.0 }
 0x260   : > { %v694_v10 = vpop.f32.mrf.mxu1 }
 0x261   : > { %v1022_v12 = vcvt.f32.s32 %v948_v9  ;;  %v718_v13 = vmul.f32 1.772, %v694_v10  ;;  %v710_v28 = vmul.f32 0.3441363, %v694_v10 }
 0x263   : > { %v759_v14 = vpack.c.b16 %v1022_v12, %v1022_v12  ;;  %v720_v15 = vadd.f32 %v718_v13, %v704_v11  ;;  %v712_v34 = vsub.f32 %v704_v11, %v710_v28 }
 0x265   : > { %v760_v17 = vpack.c.b8 %v759_v14, %v759_v14  ;;  %v950_v18 = vmax.f32 %v720_v15, 0.0 }
 0x267   : > { %953 = vst.msk [vmem:[%s1344_s18 + $0x8] sm:$0x3] %vm733_vm7, %v760_v17  ;;  %v951_v19 = vmin.f32 %v950_v18, 255.0 }
 0x268   : > { %v697_v20 = vpop.f32.mrf.mxu1 }
 0x269   : > { %v1025_v22 = vcvt.f32.s32 %v951_v19  ;;  %v705_v23 = vmul.f32 1.402, %v697_v20  ;;  %v713_v24 = vmul.f32 0.7141363, %v697_v20 }
 0x26b   : > { %v761_v25 = vpack.c.b16 %v1025_v22, %v1025_v22  ;;  %v707_v26 = vadd.f32 %v705_v23, %v703_v5  ;;  %v715_v27 = vsub.f32 %v711_v21, %v713_v24 }
 0x26d   : > { %v762_v29 = vpack.c.b8 %v761_v25, %v761_v25  ;;  %v933_v30 = vmax.f32 %v707_v26, 0.0  ;;  %v939_v31 = vmax.f32 %v715_v27, 0.0 }
 0x26f   : > { %954 = vst.msk [vmem:[%s1344_s18 + $0xa] sm:$0x3] %vm733_vm7, %v762_v29  ;;  %v934_v32 = vmin.f32 %v933_v30, 255.0  ;;  %v940_v33 = vmin.f32 %v939_v31, 255.0 }
 0x270   : > { %v700_v35 = vpop.f32.mrf.mxu1 }
 0x271   : > { %v1010_v36 = vcvt.f32.s32 %v934_v32  ;;  %v1016_v37 = vcvt.f32.s32 %v940_v33  ;;  %v706_v38 = vmul.f32 1.402, %v700_v35  ;;  %v714_v39 = vmul.f32 0.7141363, %v700_v35 }
 0x273   : > { %v729_v40 = vpack.c.b16 %v1010_v36, %v1010_v36  ;;  %v744_v41 = vpack.c.b16 %v1016_v37, %v1016_v37  ;;  %v708_v42 = vadd.f32 %v706_v38, %v704_v11  ;;  %v716_v43 = vsub.f32 %v712_v34, %v714_v39 }
 0x275   : > { %v730_v44 = vpack.c.b8 %v729_v40, %v729_v40  ;;  %v745_v45 = vpack.c.b8 %v744_v41, %v744_v41  ;;  %v936_v46 = vmax.f32 %v708_v42, 0.0  ;;  %v942_v47 = vmax.f32 %v716_v43, 0.0 }
 0x277   : > { %734 = vst.msk [vmem:[%s1344_s18] sm:$0x3] %vm733_vm7, %v730_v44  ;;  %v937_v48 = vmin.f32 %v936_v46, 255.0  ;;  %v943_v49 = vmin.f32 %v942_v47, 255.0 }
 0x278   : > { %945 = vst.msk [vmem:[%s1344_s18 + $0x4] sm:$0x3] %vm733_vm7, %v745_v45 }
 0x279   : > { %v1013_v50 = vcvt.f32.s32 %v937_v48  ;;  %v1019_v51 = vcvt.f32.s32 %v943_v49 }
 0x27b   : > { %v731_v52 = vpack.c.b16 %v1013_v50, %v1013_v50  ;;  %v746_v53 = vpack.c.b16 %v1019_v51, %v1019_v51 }
 0x27d   : > { %v732_v54 = vpack.c.b8 %v731_v52, %v731_v52  ;;  %v747_v55 = vpack.c.b8 %v746_v53, %v746_v53 }
 0x27f   : > { %735 = vst.msk [vmem:[%s1344_s18 + $0x2] sm:$0x3] %vm733_vm7, %v732_v54 }
 0x280   : > { %946 = vst.msk [vmem:[%s1344_s18 + $0x6] sm:$0x3] %vm733_vm7, %v747_v55 }
 0x281   : > { %1111 = shalt.err (!%p1108_p5)
}
 0x282   : > { %s1164_s16 = smov 32   ;;  %s1165_s18 = smov 2  }
 0x283   : > { %1027 = dma.vmem_to_hbm [thread:$0]  (%p1246_p4), %s783_s27, 192, %s785_s20, %s767_s30, %s1164_s16, %s1164_s16, %s1165_s18  }
 0x284 PF: > { %p1033_p6 = scmp.ge.s32.totalorder %s1162_s29, 2  ;;  %s799_s22 = sand.u32 1, %s1142_s24  }
 0x285   : > { %s800_s23 = scalar_lea.sflag [#allocation3], %s799_s22 }
 0x286   : > { %p1030_p7 = pnand %p1033_p6, %p1253_p8 }
 0x288   : > { %p1031_p9 = pneg %p1030_p7 }
 0x28a   : > { %1137 = dma.done.wait (%p1031_p9), %s800_s23, 192  }
 0x28b   : > { %1139 = vsyncadd (%p1031_p9), %s800_s23, 4294967104  ;;  %s20_s29 = sadd.s32 1, %s1162_s29   ;;  %s1407_s24 = smov %s1146_s25 }
 0x28c   : > { %p17_p10 = scmp.ge.s32.totalorder %s20_s29, 4   ;;  %s1408_s25 = smov %s1150_s26 }
 0x28d   : > { %s1409_s26 = smov %s1259_s14  ;;  %s1410_s27 = smov %s1158_s28 }
 0x28e   : > { %s1411_s28 = smov %s1413_s9  ;;  %19 = sbr.rel (!%p17_p10) target bundleno = 4 (0x4), region = 93 }
 0x293   :  { %806 = vsyncpa [#allocation3], 1 }
 0x294   :  { %808 = vsyncpa [#allocation3 + $0x1], 1 }

</bundles_post_ra>
